<compile_context>
chip_gen: v7x
topology: tpu7x:2x2x1
jax: 0.10.0
libtpu: 0.0.40
codegen_flags: <defaults>
</compile_context>

<pallas_src>
import functools

import jax
import jax.numpy as jnp
from jax.experimental import pallas as pl
from jax.experimental.pallas import tpu as pltpu

LANES = 128     # vreg lane width
ACC_ROWS = 8    # f32 vreg sublane height (accumulator block shape)


def _round_up(x, m):
    return ((x + m - 1) // m) * m


def _chip_kind():
    """Best-effort TPU generation string, e.g. 'tpu v6e'."""
    try:
        return jax.devices()[0].device_kind.lower()
    except Exception:
        return ""


def _loss_kernel(x_ref, t_ref, o_ref, *, rows, block_rows, steps_per_split,
                 low_precision_log):
    # x_ref, t_ref: (block_rows, LANES) tiles of logits / targets (input dtype)
    # o_ref: (ACC_ROWS, LANES) f32 per-split partial-sum block; it is revisited
    #        across the reduction axis and acts as the accumulator.
    c = pl.program_id(0)   # parallel split (its own TensorCore on v7x)
    i = pl.program_id(1)   # reduction step within this split

    @pl.when(i == 0)
    def _():
        o_ref[...] = jnp.zeros_like(o_ref)

    x = x_ref[...]
    t = t_ref[...]
    if low_precision_log:
        # bf16 EUP log (~2x log throughput on v7x); upcast only for the
        # subtract/square/accumulate, keeping the f32 accumulator.
        lg = jnp.log(x).astype(jnp.float32) - jnp.log(t).astype(jnp.float32)
    else:
        # log(x) - log(t) == log(x / t): pure EUP path, no f32 divide tail.
        lg = jnp.log(x.astype(jnp.float32)) - jnp.log(t.astype(jnp.float32))
    sq = lg * lg

    def fold(v):
        # Fold the tile into the vreg-shaped accumulator: the reshape keeps
        # (8,128) f32 tiles intact -> no data movement, just VPU vreg adds.
        o_ref[...] += jnp.sum(
            v.reshape(block_rows // ACC_ROWS, ACC_ROWS, LANES), axis=0)

    # Only tail / clamped-duplicate blocks need the row mask; interior blocks
    # skip the iota/cmp/select entirely.
    blk = c * steps_per_split + i
    needs_mask = (blk + 1) * block_rows > rows

    @pl.when(jnp.logical_not(needs_mask))
    def _():
        fold(sq)

    @pl.when(needs_mask)
    def _():
        # Overhanging last block / clamped duplicate blocks read unspecified
        # or duplicated data: mask the *squared* value to exactly 0 so no
        # NaN/Inf leaks and nothing is double counted.
        row_ids = blk * block_rows + jax.lax.broadcasted_iota(
            jnp.int32, (block_rows, LANES), 0)
        fold(jnp.where(row_ids < rows, sq, 0.0))


def sparse_categorical_loss(logits, targets):
    assert logits.shape == targets.shape
    n = logits.size
    assert n > 0

    # Common storage dtype (bf16 keeps streaming half the bytes; math is f32
    # inside the kernel).
    common = jnp.promote_types(logits.dtype, targets.dtype)
    if not jnp.issubdtype(common, jnp.floating):
        common = jnp.dtype(jnp.float32)
    common = jnp.dtype(common)
    x = logits.reshape(-1).astype(common)
    t = targets.reshape(-1).astype(common)
    out_dtype = common

    kind = _chip_kind()
    is_v7 = "v7" in kind

    # Two TensorCores per chip only on v7x: the leading "parallel" split is a
    # ~2x EUP/bandwidth win there, pure overhead on 1-TC chips (v5e/v6e).
    num_splits = 2 if is_v7 else 1
    # 4096-row (2 MiB f32) tiles amortize the ~0.35us/step pipeline cost to
    # ~90% of HBM roofline; 8192 rows on v7x where 3.2 TB/s HBM makes smaller
    # tiles overhead-dominated.  v5e keeps 4096 (fits its 16 MiB scoped VMEM).
    max_block_rows = 8192 if is_v7 else 4096

    lane_rows = n // LANES
    m = lane_rows * LANES          # elements handled by the kernel
    tail = n - m                   # < 128 ragged-tail elements

    if m == 0:
        # Fewer than one lane row: plain jnp is cheaper than a kernel launch.
        total = jnp.sum(jnp.square(
            jnp.log(x.astype(jnp.float32)) - jnp.log(t.astype(jnp.float32))))
        return (total / n).astype(out_dtype)

    # Lane-dense (rows, 128) view. Free bitcast when numel % 128 == 0 (no HBM
    # pad/concatenate pass); the tiny ragged tail is summed in jnp below.
    # TODO(synk): for huge unaligned inputs the prefix slice may still
    # materialize a copy; a flat-1D manual-DMA path would avoid it.
    rows = lane_rows
    x2 = (x if tail == 0 else x[:m]).reshape(rows, LANES)
    t2 = (t if tail == 0 else t[:m]).reshape(rows, LANES)

    # Sublane alignment depends on dtype packing (f32: 8, bf16: 16, 8-bit: 32).
    itemsize = common.itemsize
    packing = max(4 // itemsize, 1)
    row_align = ACC_ROWS * packing
    block_rows = min(max_block_rows, _round_up(rows, row_align))

    num_blocks = pl.cdiv(rows, block_rows)
    steps_per_split = pl.cdiv(num_blocks, num_splits)

    def in_map(c, i):
        # Clamp so an overhanging last step on a split still maps to a valid
        # block; its contribution is masked to 0 inside the kernel.
        return (jnp.minimum(c * steps_per_split + i, num_blocks - 1), 0)

    low_precision_log = bool(is_v7 and common == jnp.dtype(jnp.bfloat16))

    kernel = functools.partial(
        _loss_kernel, rows=rows, block_rows=block_rows,
        steps_per_split=steps_per_split, low_precision_log=low_precision_log)

    # VMEM budget: 2 inputs x 2 pipeline buffers (4 tiles) + headroom for
    # elementwise temporaries, floored at 16 MiB and capped well under every
    # generation's physical per-TC VMEM.
    tile_bytes = block_rows * LANES * itemsize
    vmem_limit = int(min(48 * 1024 * 1024,
                         max(16 * 1024 * 1024, 8 * tile_bytes + (4 << 20))))

    ne = rows * LANES
    cost = pl.CostEstimate(
        flops=4 * ne,
        transcendentals=2 * ne,
        bytes_accessed=2 * ne * itemsize + num_splits * ACC_ROWS * LANES * 4)

    # TODO(synk): on v7x, if a trace shows exposed DMA gaps at 2-deep
    # buffering, sweep pipeline_mode=pl.Buffered(3) on the two in_specs.
    partials = pl.pallas_call(
        kernel,
        out_shape=jax.ShapeDtypeStruct((num_splits * ACC_ROWS, LANES),
                                       jnp.float32),
        grid=(num_splits, steps_per_split),
        in_specs=[
            pl.BlockSpec((block_rows, LANES), in_map),
            pl.BlockSpec((block_rows, LANES), in_map),
        ],
        out_specs=pl.BlockSpec((ACC_ROWS, LANES), lambda c, i: (c, 0)),
        compiler_params=pltpu.CompilerParams(
            dimension_semantics=("parallel", "arbitrary"),
            vmem_limit_bytes=vmem_limit),
        cost_estimate=cost,
    )(x2, t2)

    # Tiny final reduction (num_splits * 8 * 128 f32 values) + ragged tail
    # (< 128 elements) + mean, done in XLA.
    total = jnp.sum(partials)
    if tail:
        xt = x[m:].astype(jnp.float32)
        tt = t[m:].astype(jnp.float32)
        total = total + jnp.sum(jnp.square(jnp.log(xt) - jnp.log(tt)))

    return (total / n).astype(out_dtype)


if __name__ == "__main__":
    key = jax.random.PRNGKey(0)
    k1, k2 = jax.random.split(key)
    # Small NCHW-style activation tensor; strictly positive inputs so log() is
    # well defined (matches valid use of the original module).
    shape = (2, 4, 16, 16)
    logits = jax.random.uniform(k1, shape, jnp.float32, minval=0.1, maxval=1.0)
    targets = jax.random.uniform(k2, shape, jnp.float32, minval=0.1, maxval=1.0)

    loss = sparse_categorical_loss(logits, targets)
    loss = jax.block_until_ready(loss)

    # Pure-JAX reference check.
    ref = jnp.mean(jnp.square(jnp.log(logits / targets)))
    assert jnp.allclose(loss, ref, rtol=1e-5, atol=1e-6), (loss, ref)

    print("KERNEL_OK")
</pallas_src>

<mosaic_0001>
module attributes {stable_mosaic.version = 11 : i64} {
  func.func @_loss_kernel(%arg0: i32, %arg1: i32, %arg2: memref<16x128xf32, #tpu.memory_space<vmem>>, %arg3: memref<16x128xf32, #tpu.memory_space<vmem>>, %arg4: memref<8x128xf32, #tpu.memory_space<vmem>>) attributes {dimension_semantics = [#tpu.dimension_semantics<parallel>, #tpu.dimension_semantics<arbitrary>], iteration_bounds = array<i64: 1, 1>, scalar_prefetch = 0 : i64, scratch_operands = 0 : i64, tpu.core_type = #tpu.core_type<tc>, window_params = [{transform_indices = @transform_0, window_bounds = array<i64: 16, 128>}, {transform_indices = @transform_1, window_bounds = array<i64: 16, 128>}, {transform_indices = @transform_2, window_bounds = array<i64: 8, 128>}]} {
    %c0_i32 = arith.constant 0 : i32
    %0 = arith.cmpi eq, %arg1, %c0_i32 : i32
    %1 = arith.extui %0 : i1 to i32
    %c0_i32_0 = arith.constant 0 : i32
    %2 = arith.cmpi ne, %1, %c0_i32_0 : i32
    scf.if %2 {
      %cst = arith.constant 0.000000e+00 : f32
      %19 = vector.broadcast %cst : f32 to vector<8x128xf32>
      %c0_8 = arith.constant 0 : index
      %c0_9 = arith.constant 0 : index
      %20 = vector.load %arg4[%c0_8, %c0_9] : memref<8x128xf32, #tpu.memory_space<vmem>>, vector<8x128xf32>
      tpu.vector_store %arg4[%c0_8, %c0_9], %19 {strides = array<i32>} : memref<8x128xf32, #tpu.memory_space<vmem>>, vector<8x128xf32>,
    } else {
    }
    %c0 = arith.constant 0 : index
    %c0_1 = arith.constant 0 : index
    %3 = vector.load %arg2[%c0, %c0_1] : memref<16x128xf32, #tpu.memory_space<vmem>>, vector<16x128xf32>
    %c0_2 = arith.constant 0 : index
    %c0_3 = arith.constant 0 : index
    %4 = vector.load %arg3[%c0_2, %c0_3] : memref<16x128xf32, #tpu.memory_space<vmem>>, vector<16x128xf32>
    %5 = math.log %3 : vector<16x128xf32>
    %6 = math.log %4 : vector<16x128xf32>
    %7 = arith.subf %5, %6 : vector<16x128xf32>
    %8 = arith.mulf %7, %7 : vector<16x128xf32>
    %c1_i32 = arith.constant 1 : i32
    %9 = arith.muli %arg0, %c1_i32 : i32
    %10 = arith.addi %9, %arg1 : i32
    %c1_i32_4 = arith.constant 1 : i32
    %11 = arith.addi %10, %c1_i32_4 : i32
    %c16_i32 = arith.constant 16 : i32
    %12 = arith.muli %11, %c16_i32 : i32
    %c16_i32_5 = arith.constant 16 : i32
    %13 = arith.cmpi sgt, %12, %c16_i32_5 : i32
    %true = arith.constant true
    %14 = arith.xori %13, %true : i1
    %15 = arith.extui %14 : i1 to i32
    %c0_i32_6 = arith.constant 0 : i32
    %16 = arith.cmpi ne, %15, %c0_i32_6 : i32
    scf.if %16 {
      %c0_8 = arith.constant 0 : index
      %c0_9 = arith.constant 0 : index
      %19 = vector.load %arg4[%c0_8, %c0_9] : memref<8x128xf32, #tpu.memory_space<vmem>>, vector<8x128xf32>
      %20 = vector.shape_cast %8 : vector<16x128xf32> to vector<2x8x128xf32>
      %cst = arith.constant dense<0.000000e+00> : vector<8x128xf32>
      %21 = vector.multi_reduction <add>, %20, %cst [0] : vector<2x8x128xf32> to vector<8x128xf32>
      %22 = arith.addf %19, %21 : vector<8x128xf32>
      %c0_10 = arith.constant 0 : index
      %c0_11 = arith.constant 0 : index
      %23 = vector.load %arg4[%c0_10, %c0_11] : memref<8x128xf32, #tpu.memory_space<vmem>>, vector<8x128xf32>
      tpu.vector_store %arg4[%c0_10, %c0_11], %22 {strides = array<i32>} : memref<8x128xf32, #tpu.memory_space<vmem>>, vector<8x128xf32>,
    } else {
    }
    %17 = arith.extui %13 : i1 to i32
    %c0_i32_7 = arith.constant 0 : i32
    %18 = arith.cmpi ne, %17, %c0_i32_7 : i32
    scf.if %18 {
      %c16_i32_8 = arith.constant 16 : i32
      %19 = arith.muli %10, %c16_i32_8 : i32
      %20 = tpu.iota {dimensions = array<i32: 0>} : vector<16x128xi32>
      %21 = vector.broadcast %19 : i32 to vector<16x128xi32>
      %22 = arith.addi %21, %20 : vector<16x128xi32>
      %c16_i32_9 = arith.constant 16 : i32
      %23 = vector.broadcast %c16_i32_9 : i32 to vector<16x128xi32>
      %24 = arith.cmpi slt, %22, %23 : vector<16x128xi32>
      %cst = arith.constant 0.000000e+00 : f32
      %25 = vector.broadcast %cst : f32 to vector<16x128xf32>
      %26 = arith.select %24, %8, %25 : vector<16x128xi1>, vector<16x128xf32>
      %c0_10 = arith.constant 0 : index
      %c0_11 = arith.constant 0 : index
      %27 = vector.load %arg4[%c0_10, %c0_11] : memref<8x128xf32, #tpu.memory_space<vmem>>, vector<8x128xf32>
      %28 = vector.shape_cast %26 : vector<16x128xf32> to vector<2x8x128xf32>
      %cst_12 = arith.constant dense<0.000000e+00> : vector<8x128xf32>
      %29 = vector.multi_reduction <add>, %28, %cst_12 [0] : vector<2x8x128xf32> to vector<8x128xf32>
      %30 = arith.addf %27, %29 : vector<8x128xf32>
      %c0_13 = arith.constant 0 : index
      %c0_14 = arith.constant 0 : index
      %31 = vector.load %arg4[%c0_13, %c0_14] : memref<8x128xf32, #tpu.memory_space<vmem>>, vector<8x128xf32>
      tpu.vector_store %arg4[%c0_13, %c0_14], %30 {strides = array<i32>} : memref<8x128xf32, #tpu.memory_space<vmem>>, vector<8x128xf32>,
    } else {
    }
    return
  }
  func.func @transform_0(%arg0: i32, %arg1: i32) -> (i32, i32) {
    %c1_i32 = arith.constant 1 : i32
    %0 = arith.muli %arg0, %c1_i32 : i32
    %1 = arith.addi %0, %arg1 : i32
    %c0_i32 = arith.constant 0 : i32
    %2 = arith.minsi %1, %c0_i32 : i32
    %c0_i32_0 = arith.constant 0 : i32
    %c0_i32_1 = arith.constant 0 : i32
    return %2, %c0_i32_0 : i32, i32
  }
  func.func @transform_1(%arg0: i32, %arg1: i32) -> (i32, i32) {
    %c1_i32 = arith.constant 1 : i32
    %0 = arith.muli %arg0, %c1_i32 : i32
    %1 = arith.addi %0, %arg1 : i32
    %c0_i32 = arith.constant 0 : i32
    %2 = arith.minsi %1, %c0_i32 : i32
    %c0_i32_0 = arith.constant 0 : i32
    %c0_i32_1 = arith.constant 0 : i32
    return %2, %c0_i32_0 : i32, i32
  }
  func.func @transform_2(%arg0: i32, %arg1: i32) -> (i32, i32) {
    %c0_i32 = arith.constant 0 : i32
    %c0_i32_0 = arith.constant 0 : i32
    return %arg0, %c0_i32 : i32, i32
  }
}

</mosaic_0001>

<bundles_post_ra>
// kernel: tpu_custom_call.1
= control target key start
LH: loop header
LB: loop body
LE: loop exit
PB: predicated region body
PF: predicated region fallthrough
CT: control target
= control target key end

     0   :  { %7 = vsyncpa [#allocation3], 0  ;;  %s273_s0 = inlined_call_operand.hbm [shape: f32[16,128], index: 0, kind: input, shape index: {}]   ;;  %s274_s1 = inlined_call_operand.hbm [shape: f32[16,128], index: 1, kind: input, shape index: {}]   ;;  %s275_s2 = inlined_call_operand.hbm [shape: f32[8,128], index: 2, kind: output, shape index: {}]  }
   0x1   :  { %8 = vsyncpa [#allocation6], 0 }
   0x2   :  { %9 = vsyncpa [#allocation4], 0  ;;  %s217_s9 = smov [#allocation2]   ;;  %s145_s13 = scalar_lea.hbm %s273_s0, 256 }
   0x3   :  { %s21_s10 = sshll.u32 %s217_s9, 4  ;;  %p146_p0 = scmp.ne.s32.totalorder %s273_s0, %s145_s13  ;;  %s22_s10 = int_to_ptr.vmem [resolvable:$true] %s21_s10 }
   0x4   :  { %p149_p1 = scmp.lt.u32.totalorder %s145_s13, %s273_s0 }
   0x6   :  { %p151_p2 = pnand %p149_p1, %p146_p0 }
   0x8   :  { %154 = shalt.err (!%p151_p2)
}
   0x9   :  { %s155_s18 = scalar_lea.vmem %s22_s10, 256  ;;  %p160_p4 = scmp.lt.s32.totalorder %s22_s10, %s22_s10 }
   0xa   :  { %p156_p3 = scmp.ne.s32.totalorder %s22_s10, %s155_s18  ;;  %p161_p5 = scmp.lt.s32.totalorder %s155_s18, %s155_s18 }
   0xc   :  { %p162_p6 = por %p161_p5, %p160_p4 }
   0xe   :  { %p163_p7 = pnand %p162_p6, %p156_p3 }
  0x10   :  { %166 = shalt.err (!%p163_p7)
}
  0x11   :  { %s218_s19 = smov 128   ;;  %s219_s20 = smov 8  }
  0x12   :  { %27 = dma.hbm_to_vmem [thread:$0]  %s273_s0, 256, %s22_s10, [#allocation3], %s218_s19, %s218_s19, %s219_s20  }
  0x13   :  { %s220_s23 = smov [#allocation5]   ;;  %s167_s27 = scalar_lea.hbm %s274_s1, 256 }
  0x14   :  { %s39_s24 = sshll.u32 %s220_s23, 4  ;;  %p168_p8 = scmp.ne.s32.totalorder %s274_s1, %s167_s27  ;;  %s40_s24 = int_to_ptr.vmem [resolvable:$true] %s39_s24 }
  0x15   :  { %p171_p9 = scmp.lt.u32.totalorder %s167_s27, %s274_s1 }
  0x17   :  { %p173_p10 = pnand %p171_p9, %p168_p8 }
  0x19   :  { %176 = shalt.err (!%p173_p10)
}
  0x1a   :  { %s177_s4 = scalar_lea.vmem %s40_s24, 256  ;;  %p182_p12 = scmp.lt.s32.totalorder %s40_s24, %s40_s24 }
  0x1b   :  { %p178_p11 = scmp.ne.s32.totalorder %s40_s24, %s177_s4  ;;  %p183_p13 = scmp.lt.s32.totalorder %s177_s4, %s177_s4 }
  0x1d   :  { %p184_p0 = por %p183_p13, %p182_p12 }
  0x1f   :  { %p185_p1 = pnand %p184_p0, %p178_p11 }
  0x21   :  { %188 = shalt.err (!%p185_p1)
}
  0x22   :  { %45 = dma.hbm_to_vmem [thread:$0]  %s274_s1, 256, %s40_s24, [#allocation6], %s218_s19, %s218_s19, %s219_s20  }
  0x23   :  { %211 = dma.done.wait [#allocation3], 256  }
  0x24   :  { %212 = vsyncadd [#allocation3], 4294967040 }
  0x25   :  { %213 = dma.done.wait [#allocation6], 256  }
  0x26   :  { %214 = vsyncadd [#allocation6], 4294967040  ;;  %v65_v0 = vld [vmem:[#allocation2] sm:$0xff]  ;;  %v66_v1 = vld [vmem:[#allocation2 + $0x8] sm:$0xff]  ;;  %s221_s1 = smov [#allocation7]  }
  0x27   :  { %v67_v2 = vld [vmem:[#allocation5] sm:$0xff]  ;;  %v68_v3 = vld [vmem:[#allocation5 + $0x8] sm:$0xff]  ;;  %137 = vlog2.f32 %v65_v0  ;;  %s117_s6 = sshll.u32 %s221_s1, 4  ;;  %s118_s6 = int_to_ptr.vmem [resolvable:$true] %s117_s6 }
  0x28   :  { %139 = vlog2.f32 %v66_v1  ;;  %s189_s7 = scalar_lea.vmem %s118_s6, 128  ;;  %p194_p3 = scmp.lt.s32.totalorder %s118_s6, %s118_s6 }
  0x29   :  { %141 = vlog2.f32 %v67_v2  ;;  %p190_p2 = scmp.ne.s32.totalorder %s118_s6, %s189_s7  ;;  %p195_p4 = scmp.lt.s32.totalorder %s189_s7, %s189_s7 }
  0x2a   :  { %143 = vlog2.f32 %v68_v3 }
  0x2b   :  { %p196_p5 = por %p195_p4, %p194_p3 }
  0x2d   :  { %p197_p6 = pnand %p196_p5, %p190_p2 }
  0x31   :  { %v138_v4 = vpop.eup %137 }
  0x32   :  { %v140_v5 = vpop.eup %139  ;;  %v70_v6 = vmul.f32 0.6931472, %v138_v4 }
  0x33   :  { %v142_v7 = vpop.eup %141  ;;  %v72_v8 = vmul.f32 0.6931472, %v140_v5 }
  0x34   :  { %v144_v9 = vpop.eup %143  ;;  %v74_v10 = vmul.f32 0.6931472, %v142_v7 }
  0x35   :  { %v76_v11 = vmul.f32 0.6931472, %v144_v9 }
  0x36   :  { %v77_v12 = vsub.f32 %v70_v6, %v74_v10 }
  0x37   :  { %v78_v13 = vsub.f32 %v72_v8, %v76_v11 }
  0x38   :  { %v79_v14 = vmul.f32 %v77_v12, %v77_v12 }
  0x39   :  { %v80_v15 = vmul.f32 %v78_v13, %v78_v13 }
  0x3b   :  { %v90_v16 = vadd.f32 %v80_v15, %v79_v14 }
  0x3d   :  { %92 = vst [vmem:[#allocation7] sm:$0xff] %v90_v16 }
  0x3e   :  { %200 = shalt.err (!%p197_p6)
}
  0x3f   :  { %s201_s10 = scalar_lea.hbm %s275_s2, 128 }
  0x40   :  { %p202_p7 = scmp.ne.s32.totalorder %s275_s2, %s201_s10  ;;  %p205_p8 = scmp.lt.u32.totalorder %s201_s10, %s275_s2 }
  0x42   :  { %p207_p9 = pnand %p205_p8, %p202_p7 }
  0x44   :  { %210 = shalt.err (!%p207_p9)
}
  0x45   :  { %120 = dma.vmem_to_hbm [thread:$0]  %s118_s6, 128, %s275_s2, [#allocation4]  }
  0x46   :  { %215 = dma.done.wait [#allocation4], 128  }
  0x47   :  { %216 = vsyncadd [#allocation4], 4294967168 }
  0x48   :  { %124 = vsyncpa [#allocation3], 1 }
  0x49   :  { %125 = vsyncpa [#allocation6], 1 }
  0x4a   :  { %126 = vsyncpa [#allocation4], 1 }

</bundles_post_ra>
